<compile_context>
chip_gen: v7x
topology: tpu7x:2x2x1
jax: 0.10.0
libtpu: 0.0.40
codegen_flags: <defaults>
</compile_context>

<pallas_src>
import functools

import jax
import jax.numpy as jnp
from jax import lax
from jax.experimental import pallas as pl
from jax.experimental.pallas import tpu as pltpu


def _pooler_kernel(x_ref, wa_ref, wm_ref, b_ref, o_ref, sum_acc, max_acc, *,
                   seq_len, tail_rows):
    s = pl.program_id(1)
    n_s = pl.num_programs(1)
    t_s = x_ref.shape[1]
    needs_mask = tail_rows != t_s                     # static Python bool

    # ---- init accumulators on the first sequence tile ----------------------
    @pl.when(s == 0)
    def _init():
        sum_acc[...] = jnp.zeros_like(sum_acc)
        max_acc[...] = jnp.full_like(max_acc, -jnp.inf)

    x = x_ref[...]                                    # (tB, tS, H), input dtype

    def _accumulate(x_sum, x_max):
        # Sum accumulates in f32 (no full-tile f32 copy); max stays in the
        # input dtype (exact for f32 / bf16 inputs).
        sum_acc[...] += jnp.sum(x_sum, axis=1, dtype=jnp.float32)   # (tB, H)
        max_acc[...] = jnp.maximum(max_acc[...], jnp.max(x_max, axis=1))

    if needs_mask:
        # Only the final S tile holds padded rows -> keep the hot loop clean
        # and run the mask exactly once, on the last step.
        @pl.when(s < n_s - 1)
        def _full_tile():
            _accumulate(x, x)

        @pl.when(s == n_s - 1)
        def _tail_tile():
            row = lax.broadcasted_iota(jnp.int32, (t_s, 1), 0)      # (tS, 1)
            valid = (row < tail_rows)[None, :, :]                   # (1, tS, 1)
            _accumulate(jnp.where(valid, x, jnp.array(0.0, x.dtype)),
                        jnp.where(valid, x, jnp.array(-jnp.inf, x.dtype)))
    else:
        _accumulate(x, x)

    # ---- epilogue: dense(2H -> 2H) + tanh, once per batch tile --------------
    @pl.when(s == n_s - 1)
    def _finalize():
        wdt = wa_ref.dtype
        avg = (sum_acc[...] * (1.0 / seq_len)).astype(wdt)          # (tB, H)
        mx = max_acc[...].astype(wdt)                               # (tB, H)
        y = jnp.dot(avg, wa_ref[...], preferred_element_type=jnp.float32)
        y = y + jnp.dot(mx, wm_ref[...], preferred_element_type=jnp.float32)
        y = y + b_ref[...].astype(jnp.float32)                      # (1, 2H)
        o_ref[...] = jnp.tanh(y).astype(o_ref.dtype)


def concat_avg_max_pooler(hidden_states, weight, bias, *, max_seq_tile_rows=None):
    """hidden_states: (B, S, H); weight: (2H, 2H) PyTorch layout (out, in);
    bias: (2H,).  Returns (B, 2H) = tanh(Linear(cat([avg, max], -1)))."""
    B, S, H = hidden_states.shape
    H2 = 2 * H
    assert weight.shape == (H2, H2), weight.shape
    assert bias.shape == (H2,), bias.shape
    x_dt = hidden_states.dtype
    assert jnp.issubdtype(x_dt, jnp.floating), (
        "floating-point inputs required (max identity is -inf)")

    x_isz = jnp.dtype(x_dt).itemsize
    w_isz = jnp.dtype(weight.dtype).itemsize
    sublane = max(8, 32 // x_isz)            # 8 (f32) / 16 (bf16) / 32 (8-bit)

    # Pre-split + pre-transpose the weight once, outside the hot loop.
    w_avg = jnp.transpose(weight[:, :H])     # (H, 2H)
    w_max = jnp.transpose(weight[:, H:])     # (H, 2H)
    b2d = bias.reshape(1, H2)

    # ---- generation-aware VMEM budget (64 MiB v7x, 128 MiB v5e/v6e) --------
    try:
        vmem_cap = int(pltpu.get_tpu_info().vmem_capacity_bytes)
    except Exception:
        vmem_cap = 64 * 1024 * 1024          # conservative default (v7x per-TC)
    budget = max(min(vmem_cap * 3 // 4, vmem_cap - (16 << 20)), 24 << 20)

    def _fixed_bytes(t_b):
        w_bytes = 2 * H * H2 * w_isz + H2 * w_isz   # resident, single-buffered
        acc_bytes = t_b * H * (4 + x_isz)            # f32 sum + dtype max scratch
        out_bytes = 2 * t_b * H2 * x_isz             # output block (double buf)
        return w_bytes + acc_bytes + out_bytes

    # ---- batch tile: prefer >= 2 tiles when B >= 16 (v7x megacore), always a
    # multiple-of-8 divisor of B (or B itself) so the output block is legal ---
    cands = []
    if B >= 16:
        for c in range(min(256, (B // 2) // 8 * 8), 7, -8):
            if B % c == 0:
                cands.append(c)
    cands.append(B)

    t_b, t_s = None, None
    for cand in cands:
        avail = budget - _fixed_bytes(cand)
        if avail <= 0:
            continue
        rows = avail // (2 * cand * H * x_isz)       # x tile is double-buffered
        if rows >= S:
            t_b, t_s = cand, S
            break
        rows = int(rows) // sublane * sublane
        if rows >= sublane:                          # fits budget: take it; else
            t_b, t_s = cand, rows                    # try a smaller batch tile
            break                                    # (never inflate past budget)
    if t_b is None:
        # TODO(synk): for very large H the resident (H, 2H) weights dominate
        # VMEM; split the dense(2H->2H)+tanh epilogue into a separate kernel /
        # plain XLA GEMM and keep only the streaming avg/max reduction here.
        t_b = 8 if (B >= 8 and B % 8 == 0) else B
        t_s = min(S, sublane)

    if max_seq_tile_rows is not None:                # test / tuning override
        t_s = min(t_s, max(sublane, max_seq_tile_rows // sublane * sublane))
        t_s = min(t_s, S)

    n_s = pl.cdiv(S, t_s)
    tail_rows = S - (n_s - 1) * t_s                  # rows valid in last S tile

    kernel = functools.partial(_pooler_kernel, seq_len=S, tail_rows=tail_rows)

    vmem_limit = int(min(vmem_cap - (8 << 20), budget + (8 << 20)))
    vmem_limit = max(vmem_limit, 32 << 20)

    def _build(single_buffer_resident):
        def _const_spec(shape):
            if single_buffer_resident:
                # Constant-index blocks: keep one resident copy in VMEM.
                return pl.BlockSpec(shape, lambda b, s: (0, 0),
                                    pipeline_mode=pl.Buffered(1))
            return pl.BlockSpec(shape, lambda b, s: (0, 0))

        return pl.pallas_call(
            kernel,
            out_shape=jax.ShapeDtypeStruct((B, H2), x_dt),
            grid_spec=pltpu.PrefetchScalarGridSpec(
                num_scalar_prefetch=0,
                grid=(B // t_b, n_s),                # reduction axis (S) last
                in_specs=[
                    pl.BlockSpec((t_b, t_s, H), lambda b, s: (b, s, 0)),
                    _const_spec((H, H2)),            # w_avg = W[:, :H].T
                    _const_spec((H, H2)),            # w_max = W[:, H:].T
                    _const_spec((1, H2)),            # bias
                ],
                out_specs=pl.BlockSpec((t_b, H2), lambda b, s: (b, 0)),
                scratch_shapes=[
                    pltpu.VMEM((t_b, H), jnp.float32),   # running sum (f32)
                    pltpu.VMEM((t_b, H), x_dt),          # running max
                ],
            ),
            compiler_params=pltpu.CompilerParams(
                dimension_semantics=("parallel", "arbitrary"),
                vmem_limit_bytes=vmem_limit,
            ),
        )

    try:
        out = _build(hasattr(pl, "Buffered"))(hidden_states, w_avg, w_max, b2d)
    except Exception:
        # API-drift guard: retry with default double-buffered resident specs.
        out = _build(False)(hidden_states, w_avg, w_max, b2d)
    return out


def _reference(hidden_states, weight, bias):
    # Pure-JAX reference mirroring the PyTorch forward (computed in f32).
    x = jnp.transpose(hidden_states.astype(jnp.float32), (0, 2, 1))  # (B, H, S)
    avg = jnp.mean(x, axis=2, keepdims=True)
    mx = jnp.max(x, axis=2, keepdims=True)
    cat = jnp.concatenate([avg, mx], axis=1)[..., 0]                 # (B, 2H)
    y = cat @ weight.astype(jnp.float32).T + bias.astype(jnp.float32)
    return jnp.tanh(y)


if __name__ == "__main__":
    key = jax.random.PRNGKey(0)
    k_x, k_w, k_b, k_x2, k_x3 = jax.random.split(key, 5)

    H = 32
    H2 = 2 * H
    weight = jax.random.normal(k_w, (H2, H2), dtype=jnp.float32) * (1.0 / jnp.sqrt(H2))
    bias = jax.random.normal(k_b, (H2,), dtype=jnp.float32) * 0.01

    # Case 1: small shapes, single tile (no masking path).
    B, S = 2, 8
    hs = jax.random.normal(k_x, (B, S, H), dtype=jnp.float32)
    out = jax.block_until_ready(concat_avg_max_pooler(hs, weight, bias))
    ref = _reference(hs, weight, bias)
    assert out.shape == (B, H2), out.shape
    assert jnp.allclose(out, ref, atol=1e-5, rtol=1e-5), \
        float(jnp.max(jnp.abs(out - ref)))

    # Case 2: multiple batch tiles (B=16 -> tB=8, 2 "parallel" tiles) and the
    # streaming S path with a masked partial last tile (S=20, tS=8 -> 3 tiles).
    B2, S2 = 16, 20
    hs2 = jax.random.normal(k_x2, (B2, S2, H), dtype=jnp.float32)
    out2 = jax.block_until_ready(
        concat_avg_max_pooler(hs2, weight, bias, max_seq_tile_rows=8))
    ref2 = _reference(hs2, weight, bias)
    assert out2.shape == (B2, H2), out2.shape
    assert jnp.allclose(out2, ref2, atol=1e-5, rtol=1e-5), \
        float(jnp.max(jnp.abs(out2 - ref2)))

    # Case 3: bf16 inputs exercise the 16-row sublane rounding and the
    # input-dtype running max (S=40, tS=16 -> 3 tiles, last masked).
    B3, S3 = 4, 40
    hs3 = jax.random.normal(k_x3, (B3, S3, H), dtype=jnp.float32).astype(jnp.bfloat16)
    out3 = jax.block_until_ready(
        concat_avg_max_pooler(hs3, weight, bias, max_seq_tile_rows=16))
    ref3 = _reference(hs3, weight, bias)
    assert out3.shape == (B3, H2), out3.shape
    assert jnp.allclose(out3.astype(jnp.float32), ref3, atol=2e-2), \
        float(jnp.max(jnp.abs(out3.astype(jnp.float32) - ref3)))

    print("KERNEL_OK")
</pallas_src>

<mosaic_0001>
module attributes {stable_mosaic.version = 11 : i64} {
  func.func @_pooler_kernel(%arg0: i32, %arg1: i32, %arg2: memref<2x8x32xf32, #tpu.memory_space<vmem>>, %arg3: memref<32x64xf32, #tpu.memory_space<vmem>>, %arg4: memref<32x64xf32, #tpu.memory_space<vmem>>, %arg5: memref<1x64xf32, #tpu.memory_space<vmem>>, %arg6: memref<2x64xf32, #tpu.memory_space<vmem>>, %arg7: memref<2x32xf32, #tpu.memory_space<vmem>>, %arg8: memref<2x32xf32, #tpu.memory_space<vmem>>) attributes {dimension_semantics = [#tpu.dimension_semantics<parallel>, #tpu.dimension_semantics<arbitrary>], iteration_bounds = array<i64: 1, 1>, scalar_prefetch = 0 : i64, scratch_operands = 2 : i64, tpu.core_type = #tpu.core_type<tc>, window_params = [{transform_indices = @transform_0, window_bounds = array<i64: 2, 8, 32>}, {pipeline_mode = #tpu.pipeline_mode<synchronous>, transform_indices = @transform_1, window_bounds = array<i64: 32, 64>}, {pipeline_mode = #tpu.pipeline_mode<synchronous>, transform_indices = @transform_2, window_bounds = array<i64: 32, 64>}, {pipeline_mode = #tpu.pipeline_mode<synchronous>, transform_indices = @transform_3, window_bounds = array<i64: 1, 64>}, {transform_indices = @transform_4, window_bounds = array<i64: 2, 64>}]} {
    %c0_i32 = arith.constant 0 : i32
    %0 = arith.cmpi eq, %arg1, %c0_i32 : i32
    %1 = arith.extui %0 : i1 to i32
    %c0_i32_0 = arith.constant 0 : i32
    %2 = arith.cmpi ne, %1, %c0_i32_0 : i32
    scf.if %2 {
      %cst_14 = arith.constant 0.000000e+00 : f32
      %15 = vector.broadcast %cst_14 : f32 to vector<2x32xf32>
      %c0_15 = arith.constant 0 : index
      %c0_16 = arith.constant 0 : index
      %16 = vector.load %arg7[%c0_15, %c0_16] : memref<2x32xf32, #tpu.memory_space<vmem>>, vector<2x32xf32>
      tpu.vector_store %arg7[%c0_15, %c0_16], %15 {strides = array<i32>} : memref<2x32xf32, #tpu.memory_space<vmem>>, vector<2x32xf32>,
      %cst_17 = arith.constant 0xFF800000 : f32
      %17 = vector.broadcast %cst_17 : f32 to vector<2x32xf32>
      %c0_18 = arith.constant 0 : index
      %c0_19 = arith.constant 0 : index
      %18 = vector.load %arg8[%c0_18, %c0_19] : memref<2x32xf32, #tpu.memory_space<vmem>>, vector<2x32xf32>
      tpu.vector_store %arg8[%c0_18, %c0_19], %17 {strides = array<i32>} : memref<2x32xf32, #tpu.memory_space<vmem>>, vector<2x32xf32>,
    } else {
    }
    %c0 = arith.constant 0 : index
    %c0_1 = arith.constant 0 : index
    %c0_2 = arith.constant 0 : index
    %3 = vector.load %arg2[%c0, %c0_1, %c0_2] : memref<2x8x32xf32, #tpu.memory_space<vmem>>, vector<2x8x32xf32>
    %c0_3 = arith.constant 0 : index
    %c0_4 = arith.constant 0 : index
    %4 = vector.load %arg7[%c0_3, %c0_4] : memref<2x32xf32, #tpu.memory_space<vmem>>, vector<2x32xf32>
    %cst = arith.constant dense<0.000000e+00> : vector<2x32xf32>
    %5 = vector.multi_reduction <add>, %3, %cst [1] : vector<2x8x32xf32> to vector<2x32xf32>
    %6 = arith.addf %4, %5 : vector<2x32xf32>
    %c0_5 = arith.constant 0 : index
    %c0_6 = arith.constant 0 : index
    %7 = vector.load %arg7[%c0_5, %c0_6] : memref<2x32xf32, #tpu.memory_space<vmem>>, vector<2x32xf32>
    tpu.vector_store %arg7[%c0_5, %c0_6], %6 {strides = array<i32>} : memref<2x32xf32, #tpu.memory_space<vmem>>, vector<2x32xf32>,
    %c0_7 = arith.constant 0 : index
    %c0_8 = arith.constant 0 : index
    %8 = vector.load %arg8[%c0_7, %c0_8] : memref<2x32xf32, #tpu.memory_space<vmem>>, vector<2x32xf32>
    %cst_9 = arith.constant dense<0xFF800000> : vector<2x32xf32>
    %9 = vector.multi_reduction <maximumf>, %3, %cst_9 [1] : vector<2x8x32xf32> to vector<2x32xf32>
    %10 = arith.maximumf %8, %9 : vector<2x32xf32>
    %c0_10 = arith.constant 0 : index
    %c0_11 = arith.constant 0 : index
    %11 = vector.load %arg8[%c0_10, %c0_11] : memref<2x32xf32, #tpu.memory_space<vmem>>, vector<2x32xf32>
    tpu.vector_store %arg8[%c0_10, %c0_11], %10 {strides = array<i32>} : memref<2x32xf32, #tpu.memory_space<vmem>>, vector<2x32xf32>,
    %c0_i32_12 = arith.constant 0 : i32
    %12 = arith.cmpi eq, %arg1, %c0_i32_12 : i32
    %13 = arith.extui %12 : i1 to i32
    %c0_i32_13 = arith.constant 0 : i32
    %14 = arith.cmpi ne, %13, %c0_i32_13 : i32
    scf.if %14 {
      %c0_14 = arith.constant 0 : index
      %c0_15 = arith.constant 0 : index
      %15 = vector.load %arg7[%c0_14, %c0_15] : memref<2x32xf32, #tpu.memory_space<vmem>>, vector<2x32xf32>
      %cst_16 = arith.constant 1.250000e-01 : f32
      %16 = vector.broadcast %cst_16 : f32 to vector<2x32xf32>
      %17 = arith.mulf %15, %16 : vector<2x32xf32>
      %c0_17 = arith.constant 0 : index
      %c0_18 = arith.constant 0 : index
      %18 = vector.load %arg8[%c0_17, %c0_18] : memref<2x32xf32, #tpu.memory_space<vmem>>, vector<2x32xf32>
      %c0_19 = arith.constant 0 : index
      %c0_20 = arith.constant 0 : index
      %19 = vector.load %arg3[%c0_19, %c0_20] : memref<32x64xf32, #tpu.memory_space<vmem>>, vector<32x64xf32>
      %cst_21 = arith.constant dense<0.000000e+00> : vector<2x64xf32>
      %20 = tpu.matmul %17, %19, %cst_21 {dimension_numbers = #tpu.dot_dimension_numbers<[1], [0], [0], [1], [0, 0, 1, 1], [], []>} : vector<2x32xf32>, vector<32x64xf32>, vector<2x64xf32> -> vector<2x64xf32>
      %c0_22 = arith.constant 0 : index
      %c0_23 = arith.constant 0 : index
      %21 = vector.load %arg4[%c0_22, %c0_23] : memref<32x64xf32, #tpu.memory_space<vmem>>, vector<32x64xf32>
      %cst_24 = arith.constant dense<0.000000e+00> : vector<2x64xf32>
      %22 = tpu.matmul %18, %21, %cst_24 {dimension_numbers = #tpu.dot_dimension_numbers<[1], [0], [0], [1], [0, 0, 1, 1], [], []>} : vector<2x32xf32>, vector<32x64xf32>, vector<2x64xf32> -> vector<2x64xf32>
      %23 = arith.addf %20, %22 : vector<2x64xf32>
      %c0_25 = arith.constant 0 : index
      %c0_26 = arith.constant 0 : index
      %24 = vector.load %arg5[%c0_25, %c0_26] : memref<1x64xf32, #tpu.memory_space<vmem>>, vector<1x64xf32>
      %25 = vector.broadcast %24 : vector<1x64xf32> to vector<2x64xf32>
      %26 = arith.addf %23, %25 : vector<2x64xf32>
      %27 = math.tanh %26 : vector<2x64xf32>
      %c0_27 = arith.constant 0 : index
      %c0_28 = arith.constant 0 : index
      %28 = vector.load %arg6[%c0_27, %c0_28] : memref<2x64xf32, #tpu.memory_space<vmem>>, vector<2x64xf32>
      tpu.vector_store %arg6[%c0_27, %c0_28], %27 {strides = array<i32>} : memref<2x64xf32, #tpu.memory_space<vmem>>, vector<2x64xf32>,
    } else {
    }
    return
  }
  func.func @transform_0(%arg0: i32, %arg1: i32) -> (i32, i32, i32) {
    %c0_i32 = arith.constant 0 : i32
    %c0_i32_0 = arith.constant 0 : i32
    return %arg0, %arg1, %c0_i32 : i32, i32, i32
  }
  func.func @transform_1(%arg0: i32, %arg1: i32) -> (i32, i32) {
    %c0_i32 = arith.constant 0 : i32
    %c0_i32_0 = arith.constant 0 : i32
    %c0_i32_1 = arith.constant 0 : i32
    return %c0_i32, %c0_i32_0 : i32, i32
  }
  func.func @transform_2(%arg0: i32, %arg1: i32) -> (i32, i32) {
    %c0_i32 = arith.constant 0 : i32
    %c0_i32_0 = arith.constant 0 : i32
    %c0_i32_1 = arith.constant 0 : i32
    return %c0_i32, %c0_i32_0 : i32, i32
  }
  func.func @transform_3(%arg0: i32, %arg1: i32) -> (i32, i32) {
    %c0_i32 = arith.constant 0 : i32
    %c0_i32_0 = arith.constant 0 : i32
    %c0_i32_1 = arith.constant 0 : i32
    return %c0_i32, %c0_i32_0 : i32, i32
  }
  func.func @transform_4(%arg0: i32, %arg1: i32) -> (i32, i32) {
    %c0_i32 = arith.constant 0 : i32
    %c0_i32_0 = arith.constant 0 : i32
    return %arg0, %c0_i32 : i32, i32
  }
}

module attributes {stable_mosaic.version = 11 : i64} {
  func.func @_pooler_kernel(%arg0: i32, %arg1: i32, %arg2: memref<2x8x32xf32, #tpu.memory_space<vmem>>, %arg3: memref<32x64xf32, #tpu.memory_space<vmem>>, %arg4: memref<32x64xf32, #tpu.memory_space<vmem>>, %arg5: memref<1x64xf32, #tpu.memory_space<vmem>>, %arg6: memref<2x64xf32, #tpu.memory_space<vmem>>, %arg7: memref<2x32xf32, #tpu.memory_space<vmem>>, %arg8: memref<2x32xf32, #tpu.memory_space<vmem>>) attributes {dimension_semantics = [#tpu.dimension_semantics<parallel>, #tpu.dimension_semantics<arbitrary>], iteration_bounds = array<i64: 1, 1>, scalar_prefetch = 0 : i64, scratch_operands = 2 : i64, tpu.core_type = #tpu.core_type<tc>, window_params = [{transform_indices = @transform_0, window_bounds = array<i64: 2, 8, 32>}, {pipeline_mode = #tpu.pipeline_mode<synchronous>, transform_indices = @transform_1, window_bounds = array<i64: 32, 64>}, {pipeline_mode = #tpu.pipeline_mode<synchronous>, transform_indices = @transform_2, window_bounds = array<i64: 32, 64>}, {pipeline_mode = #tpu.pipeline_mode<synchronous>, transform_indices = @transform_3, window_bounds = array<i64: 1, 64>}, {transform_indices = @transform_4, window_bounds = array<i64: 2, 64>}]} {
    %c0_i32 = arith.constant 0 : i32
    %0 = arith.cmpi eq, %arg1, %c0_i32 : i32
    %1 = arith.extui %0 : i1 to i32
    %c0_i32_0 = arith.constant 0 : i32
    %2 = arith.cmpi ne, %1, %c0_i32_0 : i32
    scf.if %2 {
      %cst_14 = arith.constant 0.000000e+00 : f32
      %15 = vector.broadcast %cst_14 : f32 to vector<2x32xf32>
      %c0_15 = arith.constant 0 : index
      %c0_16 = arith.constant 0 : index
      %16 = vector.load %arg7[%c0_15, %c0_16] : memref<2x32xf32, #tpu.memory_space<vmem>>, vector<2x32xf32>
      tpu.vector_store %arg7[%c0_15, %c0_16], %15 {strides = array<i32>} : memref<2x32xf32, #tpu.memory_space<vmem>>, vector<2x32xf32>,
      %cst_17 = arith.constant 0xFF800000 : f32
      %17 = vector.broadcast %cst_17 : f32 to vector<2x32xf32>
      %c0_18 = arith.constant 0 : index
      %c0_19 = arith.constant 0 : index
      %18 = vector.load %arg8[%c0_18, %c0_19] : memref<2x32xf32, #tpu.memory_space<vmem>>, vector<2x32xf32>
      tpu.vector_store %arg8[%c0_18, %c0_19], %17 {strides = array<i32>} : memref<2x32xf32, #tpu.memory_space<vmem>>, vector<2x32xf32>,
    } else {
    }
    %c0 = arith.constant 0 : index
    %c0_1 = arith.constant 0 : index
    %c0_2 = arith.constant 0 : index
    %3 = vector.load %arg2[%c0, %c0_1, %c0_2] : memref<2x8x32xf32, #tpu.memory_space<vmem>>, vector<2x8x32xf32>
    %c0_3 = arith.constant 0 : index
    %c0_4 = arith.constant 0 : index
    %4 = vector.load %arg7[%c0_3, %c0_4] : memref<2x32xf32, #tpu.memory_space<vmem>>, vector<2x32xf32>
    %cst = arith.constant dense<0.000000e+00> : vector<2x32xf32>
    %5 = vector.multi_reduction <add>, %3, %cst [1] : vector<2x8x32xf32> to vector<2x32xf32>
    %6 = arith.addf %4, %5 : vector<2x32xf32>
    %c0_5 = arith.constant 0 : index
    %c0_6 = arith.constant 0 : index
    %7 = vector.load %arg7[%c0_5, %c0_6] : memref<2x32xf32, #tpu.memory_space<vmem>>, vector<2x32xf32>
    tpu.vector_store %arg7[%c0_5, %c0_6], %6 {strides = array<i32>} : memref<2x32xf32, #tpu.memory_space<vmem>>, vector<2x32xf32>,
    %c0_7 = arith.constant 0 : index
    %c0_8 = arith.constant 0 : index
    %8 = vector.load %arg8[%c0_7, %c0_8] : memref<2x32xf32, #tpu.memory_space<vmem>>, vector<2x32xf32>
    %cst_9 = arith.constant dense<0xFF800000> : vector<2x32xf32>
    %9 = vector.multi_reduction <maximumf>, %3, %cst_9 [1] : vector<2x8x32xf32> to vector<2x32xf32>
    %10 = arith.maximumf %8, %9 : vector<2x32xf32>
    %c0_10 = arith.constant 0 : index
    %c0_11 = arith.constant 0 : index
    %11 = vector.load %arg8[%c0_10, %c0_11] : memref<2x32xf32, #tpu.memory_space<vmem>>, vector<2x32xf32>
    tpu.vector_store %arg8[%c0_10, %c0_11], %10 {strides = array<i32>} : memref<2x32xf32, #tpu.memory_space<vmem>>, vector<2x32xf32>,
    %c0_i32_12 = arith.constant 0 : i32
    %12 = arith.cmpi eq, %arg1, %c0_i32_12 : i32
    %13 = arith.extui %12 : i1 to i32
    %c0_i32_13 = arith.constant 0 : i32
    %14 = arith.cmpi ne, %13, %c0_i32_13 : i32
    scf.if %14 {
      %c0_14 = arith.constant 0 : index
      %c0_15 = arith.constant 0 : index
      %15 = vector.load %arg7[%c0_14, %c0_15] : memref<2x32xf32, #tpu.memory_space<vmem>>, vector<2x32xf32>
      %cst_16 = arith.constant 1.250000e-01 : f32
      %16 = vector.broadcast %cst_16 : f32 to vector<2x32xf32>
      %17 = arith.mulf %15, %16 : vector<2x32xf32>
      %c0_17 = arith.constant 0 : index
      %c0_18 = arith.constant 0 : index
      %18 = vector.load %arg8[%c0_17, %c0_18] : memref<2x32xf32, #tpu.memory_space<vmem>>, vector<2x32xf32>
      %c0_19 = arith.constant 0 : index
      %c0_20 = arith.constant 0 : index
      %19 = vector.load %arg3[%c0_19, %c0_20] : memref<32x64xf32, #tpu.memory_space<vmem>>, vector<32x64xf32>
      %cst_21 = arith.constant dense<0.000000e+00> : vector<2x64xf32>
      %20 = tpu.matmul %17, %19, %cst_21 {dimension_numbers = #tpu.dot_dimension_numbers<[1], [0], [0], [1], [0, 0, 1, 1], [], []>} : vector<2x32xf32>, vector<32x64xf32>, vector<2x64xf32> -> vector<2x64xf32>
      %c0_22 = arith.constant 0 : index
      %c0_23 = arith.constant 0 : index
      %21 = vector.load %arg4[%c0_22, %c0_23] : memref<32x64xf32, #tpu.memory_space<vmem>>, vector<32x64xf32>
      %cst_24 = arith.constant dense<0.000000e+00> : vector<2x64xf32>
      %22 = tpu.matmul %18, %21, %cst_24 {dimension_numbers = #tpu.dot_dimension_numbers<[1], [0], [0], [1], [0, 0, 1, 1], [], []>} : vector<2x32xf32>, vector<32x64xf32>, vector<2x64xf32> -> vector<2x64xf32>
      %23 = arith.addf %20, %22 : vector<2x64xf32>
      %c0_25 = arith.constant 0 : index
      %c0_26 = arith.constant 0 : index
      %24 = vector.load %arg5[%c0_25, %c0_26] : memref<1x64xf32, #tpu.memory_space<vmem>>, vector<1x64xf32>
      %25 = vector.broadcast %24 : vector<1x64xf32> to vector<2x64xf32>
      %26 = arith.addf %23, %25 : vector<2x64xf32>
      %27 = math.tanh %26 : vector<2x64xf32>
      %c0_27 = arith.constant 0 : index
      %c0_28 = arith.constant 0 : index
      %28 = vector.load %arg6[%c0_27, %c0_28] : memref<2x64xf32, #tpu.memory_space<vmem>>, vector<2x64xf32>
      tpu.vector_store %arg6[%c0_27, %c0_28], %27 {strides = array<i32>} : memref<2x64xf32, #tpu.memory_space<vmem>>, vector<2x64xf32>,
    } else {
    }
    return
  }
  func.func @transform_0(%arg0: i32, %arg1: i32) -> (i32, i32, i32) {
    %c0_i32 = arith.constant 0 : i32
    %c0_i32_0 = arith.constant 0 : i32
    return %arg0, %arg1, %c0_i32 : i32, i32, i32
  }
  func.func @transform_1(%arg0: i32, %arg1: i32) -> (i32, i32) {
    %c0_i32 = arith.constant 0 : i32
    %c0_i32_0 = arith.constant 0 : i32
    %c0_i32_1 = arith.constant 0 : i32
    return %c0_i32, %c0_i32_0 : i32, i32
  }
  func.func @transform_2(%arg0: i32, %arg1: i32) -> (i32, i32) {
    %c0_i32 = arith.constant 0 : i32
    %c0_i32_0 = arith.constant 0 : i32
    %c0_i32_1 = arith.constant 0 : i32
    return %c0_i32, %c0_i32_0 : i32, i32
  }
  func.func @transform_3(%arg0: i32, %arg1: i32) -> (i32, i32) {
    %c0_i32 = arith.constant 0 : i32
    %c0_i32_0 = arith.constant 0 : i32
    %c0_i32_1 = arith.constant 0 : i32
    return %c0_i32, %c0_i32_0 : i32, i32
  }
  func.func @transform_4(%arg0: i32, %arg1: i32) -> (i32, i32) {
    %c0_i32 = arith.constant 0 : i32
    %c0_i32_0 = arith.constant 0 : i32
    return %arg0, %c0_i32 : i32, i32
  }
}

</mosaic_0001>

<bundles_post_ra>
// kernel: tpu_custom_call.1
= control target key start
LH: loop header
LB: loop body
LE: loop exit
PB: predicated region body
PF: predicated region fallthrough
CT: control target
= control target key end

     0   :  { %9 = vsyncpa [#allocation5], 0  ;;  %s565_s0 = inlined_call_operand.hbm [shape: f32[2,8,32], index: 0, kind: input, shape index: {}]   ;;  %s566_s1 = inlined_call_operand.hbm [shape: f32[32,64], index: 1, kind: input, shape index: {}]   ;;  %s567_s2 = inlined_call_operand.hbm [shape: f32[32,64], index: 2, kind: input, shape index: {}]   ;;  %s568_s3 = inlined_call_operand.vmem [shape: f32[1,64], index: 3, kind: input, shape index: {}]   ;;  %s569_s4 = inlined_call_operand.hbm [shape: f32[2,64], index: 4, kind: output, shape index: {}]  }
   0x1   :  { %10 = vsyncpa [#allocation8], 0 }
   0x2   :  { %11 = vsyncpa [#allocation6], 0  ;;  %s453_s15 = smov [#allocation7]   ;;  %s454_s17 = smov [#allocation4]  }
   0x3   :  { %s29_s16 = sshll.u32 %s453_s15, 4  ;;  %s17_s18 = sshll.u32 %s454_s17, 4  ;;  %s30_s16 = int_to_ptr.vmem [resolvable:$true] %s29_s16  ;;  %s488_s18 = int_to_ptr.vmem [resolvable:$true] %s17_s18 }
   0x4   :  { %s359_s21 = scalar_lea.hbm %s566_s1, 512 }
   0x5   :  { %p360_p0 = scmp.ne.s32.totalorder %s566_s1, %s359_s21  ;;  %p363_p1 = scmp.lt.u32.totalorder %s359_s21, %s566_s1 }
   0x7   :  { %p365_p2 = pnand %p363_p1, %p360_p0 }
   0x9   :  { %368 = shalt.err (!%p365_p2)
}
   0xa   :  { %s369_s26 = scalar_lea.vmem %s30_s16, 512  ;;  %p374_p4 = scmp.lt.s32.totalorder %s30_s16, %s30_s16 }
   0xb   :  { %p370_p3 = scmp.ne.s32.totalorder %s30_s16, %s369_s26  ;;  %p375_p5 = scmp.lt.s32.totalorder %s369_s26, %s369_s26 }
   0xd   :  { %p376_p6 = por %p375_p5, %p374_p4 }
   0xf   :  { %p377_p7 = pnand %p376_p6, %p370_p3 }
  0x11   :  { %380 = shalt.err (!%p377_p7)
}
  0x12   :  { %s455_s27 = smov 128   ;;  %s456_s28 = smov 8  }
  0x13   :  { %35 = dma.hbm_to_vmem [thread:$0]  %s566_s1, 512, %s30_s16, [#allocation8], %s455_s27, %s455_s27, %s456_s28  }
  0x14   :  { %s381_s7 = scalar_lea.hbm %s565_s0, 256 }
  0x15   :  { %p382_p8 = scmp.ne.s32.totalorder %s565_s0, %s381_s7  ;;  %p385_p9 = scmp.lt.u32.totalorder %s381_s7, %s565_s0 }
  0x17   :  { %p387_p10 = pnand %p385_p9, %p382_p8 }
  0x19   :  { %390 = shalt.err (!%p387_p10)
}
  0x1a   :  { %s391_s12 = scalar_lea.vmem %s488_s18, 256  ;;  %p396_p12 = scmp.lt.s32.totalorder %s488_s18, %s488_s18 }
  0x1b   :  { %p392_p11 = scmp.ne.s32.totalorder %s488_s18, %s391_s12  ;;  %p397_p13 = scmp.lt.s32.totalorder %s391_s12, %s391_s12 }
  0x1d   :  { %p398_p0 = por %p397_p13, %p396_p12 }
  0x1f   :  { %p399_p1 = pnand %p398_p0, %p392_p11 }
  0x21   :  { %402 = shalt.err (!%p399_p1)
}
  0x22   :  { %23 = dma.hbm_to_vmem [thread:$0]  %s565_s0, 256, %s488_s18, [#allocation5], %s455_s27, %s455_s27, %s456_s28  }
  0x23   :  { %s457_s14 = smov [#allocation9]   ;;  %s403_s19 = scalar_lea.hbm %s567_s2, 512 }
  0x24   :  { %s41_s15 = sshll.u32 %s457_s14, 4  ;;  %p404_p2 = scmp.ne.s32.totalorder %s567_s2, %s403_s19  ;;  %s42_s15 = int_to_ptr.vmem [resolvable:$true] %s41_s15 }
  0x25   :  { %p407_p3 = scmp.lt.u32.totalorder %s403_s19, %s567_s2 }
  0x27   :  { %p409_p4 = pnand %p407_p3, %p404_p2 }
  0x29   :  { %412 = shalt.err (!%p409_p4)
}
  0x2a   :  { %s413_s24 = scalar_lea.vmem %s42_s15, 512  ;;  %p418_p6 = scmp.lt.s32.totalorder %s42_s15, %s42_s15 }
  0x2b   :  { %p414_p5 = scmp.ne.s32.totalorder %s42_s15, %s413_s24  ;;  %p419_p7 = scmp.lt.s32.totalorder %s413_s24, %s413_s24 }
  0x2d   :  { %p420_p8 = por %p419_p7, %p418_p6 }
  0x2f   :  { %p421_p9 = pnand %p420_p8, %p414_p5 }
  0x31   :  { %424 = shalt.err (!%p421_p9)
}
  0x32   :  { %47 = dma.hbm_to_vmem [thread:$0]  %s567_s2, 512, %s42_s15, [#allocation8], %s455_s27, %s455_s27, %s456_s28  }
  0x33   :  { %447 = dma.done.wait [#allocation5], 256  }
  0x34   :  { %448 = vsyncadd [#allocation5], 4294967040 }
  0x35   :  { %449 = dma.done.wait [#allocation8], 1024  }
  0x36   :  { %450 = vsyncadd [#allocation8], 4294966272  ;;  %vm63_vm0 = vcmask 254976   ;;  %v458_v0 = vmov 0.0|0.0   ;;  %v459_v1 = vmov 0.0   ;;  %v460_v2 = vmov -inf  }
  0x37   :  { %335 = vmatprep.subr.bf16.mxu0 %v458_v0  ;;  %341 = vmatprep.subr.bf16.mxu1 %v458_v0  ;;  %64 = vst.msk [vmem:[#allocation2] sm:$0x3] %vm63_vm0, %v459_v1  ;;  %65 = vst.msk [vmem:[#allocation3] sm:$0x3] %vm63_vm0, %v460_v2  ;;  %vm461_vm1 = vmmov 0   ;;  %v123_v3 = vld [vmem:[#allocation9] sm:$0xff] }
  0x38   :  { %321 = vmatprep.mubr.msk.f32.mxu0 %vm461_vm1, %v459_v1  ;;  %332 = vmatprep.mubr.msk.f32.mxu1 %vm461_vm1, %v459_v1  ;;  %v124_v4 = vld [vmem:[#allocation9 + $0x8] sm:$0xff]  ;;  %v119_v5 = vld [vmem:[#allocation7] sm:$0xff]  ;;  %vm69_vm2 = vcmask 261120   ;;  %v125_v8 = vld [vmem:[#allocation9 + $0x10] sm:$0xff]  ;;  %vm86_vm3 = vcmask 1041409   ;;  %s462_s26 = smov [#allocation10]  }
  0x39   :  { %v336_v6 = vpack.c.bf16 %v124_v4, %v123_v3  ;;  %v120_v7 = vld [vmem:[#allocation7 + $0x8] sm:$0xff]  ;;  %v126_v9 = vld [vmem:[#allocation9 + $0x18] sm:$0xff]  ;;  %v121_v11 = vld [vmem:[#allocation7 + $0x10] sm:$0xff]  ;;  %s290_s27 = sshll.u32 %s462_s26, 4  ;;  %vm282_vm4 = vcmask 517120   ;;  %s291_s27 = int_to_ptr.vmem [resolvable:$true] %s290_s27 }
  0x3a   :  { %v342_v10 = vpack.c.bf16 %v120_v7, %v119_v5  ;;  %v122_v12 = vld [vmem:[#allocation7 + $0x18] sm:$0xff]  ;;  %v66_v13 = vld [vmem:[#allocation4] sm:$0xff]  ;;  %v339_v14 = vpack.c.bf16 %v126_v9, %v125_v8  ;;  %v302_v57 = vld [vmem:[%s568_s3] ss:$0 sm:$0xff]  ;;  %s425_s28 = scalar_lea.vmem %s291_s27, 32  ;;  %p430_p11 = scmp.lt.s32.totalorder %s291_s27, %s291_s27 }
  0x3b   :  { %337 = vmatpush3.bf16.msra.mxu0 %v336_v6  ;;  %v345_v15 = vpack.c.bf16 %v122_v12, %v121_v11  ;;  %v67_v16 = vld [vmem:[#allocation4 + $0x8] sm:$0xff]  ;;  %v70_v17 = vsel %vm69_vm2, %v66_v13, 0.0  ;;  %v93_v20 = vsel %vm69_vm2, %v66_v13, -inf  ;;  %p426_p10 = scmp.ne.s32.totalorder %s291_s27, %s425_s28  ;;  %p431_p12 = scmp.lt.s32.totalorder %s425_s28, %s425_s28 }
  0x3c   :  { %343 = vmatpush3.bf16.msra.mxu1 %v342_v10  ;;  %338 = vmatprep.subr.bf16.mxu0 %v458_v0  ;;  %v71_v18 = vrot.slane %v70_v17, 4  ;;  %v77_v19 = vsel %vm69_vm2, %v67_v16, 0.0  ;;  %v100_v21 = vsel %vm69_vm2, %v67_v16, -inf  ;;  %v94_v23 = vrot.slane %v93_v20, 4 }
  0x3d   :  { %344 = vmatprep.subr.bf16.mxu1 %v458_v0  ;;  %v78_v22 = vrot.slane %v77_v19, 4  ;;  %v101_v24 = vrot.slane %v100_v21, 4  ;;  %p432_p13 = por %p431_p12, %p430_p11 }
  0x3e   :  { %v72_v25 = vadd.f32 %v71_v18, %v70_v17  ;;  %v95_v27 = vmax.f32 %v93_v20, %v94_v23  ;;  %v68_v42 = vld [vmem:[#allocation2] sm:$0x3]  ;;  %v92_v44 = vld [vmem:[#allocation3] sm:$0x3] }
  0x3f   :  { %340 = vmatpush3.bf16.msra.mxu0 %v339_v14  ;;  %v79_v26 = vadd.f32 %v78_v22, %v77_v19  ;;  %v102_v28 = vmax.f32 %v100_v21, %v101_v24  ;;  %p433_p0 = pnand %p432_p13, %p426_p10 }
  0x40   :  { %346 = vmatpush3.bf16.msra.mxu1 %v345_v15  ;;  %v73_v29 = vrot.slane %v72_v25, 2  ;;  %v96_v31 = vrot.slane %v95_v27, 2 }
  0x41   :  { %v80_v30 = vrot.slane %v79_v26, 2  ;;  %v103_v32 = vrot.slane %v102_v28, 2 }
  0x42   :  { %v74_v33 = vadd.f32 %v73_v29, %v72_v25  ;;  %v97_v35 = vmax.f32 %v95_v27, %v96_v31 }
  0x43   :  { %v81_v34 = vadd.f32 %v80_v30, %v79_v26  ;;  %v104_v36 = vmax.f32 %v102_v28, %v103_v32 }
  0x44   :  { %v75_v37 = vrot.slane %v74_v33, 1  ;;  %v98_v39 = vrot.slane %v97_v35, 1 }
  0x45   :  { %v82_v38 = vrot.slane %v81_v34, 1  ;;  %v105_v40 = vrot.slane %v104_v36, 1 }
  0x46   :  { %v76_v41 = vadd.f32 %v75_v37, %v74_v33  ;;  %v99_v45 = vmax.f32 %v97_v35, %v98_v39 }
  0x47   :  { %v83_v43 = vadd.f32 %v82_v38, %v81_v34  ;;  %v106_v46 = vmax.f32 %v104_v36, %v105_v40 }
  0x49   :  { %v87_v47 = vsel %vm86_vm3, %v83_v43, %v76_v41  ;;  %v109_v48 = vsel %vm86_vm3, %v106_v46, %v99_v45 }
  0x4a   :  { %v89_v49 = vadd.f32 %v87_v47, %v68_v42  ;;  %v111_v50 = vmax.f32 %v92_v44, %v109_v48 }
  0x4c   :  { %112 = vst.msk [vmem:[#allocation3] sm:$0x3] %vm63_vm0, %v111_v50  ;;  %91 = vst.msk [vmem:[#allocation2] sm:$0x3] %vm63_vm0, %v89_v49 }
  0x53   :  { %v118_v51 = vld [vmem:[#allocation3] sm:$0x3]  ;;  %v116_v52 = vld [vmem:[#allocation2] sm:$0x3] }
  0x54   :  { %322 = vmatmul.mubr.msk.f32.vlgmr.msra.gmra.mrb[0].mxu0 %vm69_vm2, %v118_v51  ;;  %v117_v53 = vmul.f32 0.125, %v116_v52 }
  0x56   :  { %333 = vmatmul.mubr.msk.f32.vlgmr.msra.gmra.mrb[0].mxu1 %vm69_vm2, %v117_v53 }
 0x127   :  { %v196_v54 = vpop.f32.mrb[0].mxu0 }
 0x128   :  { %v323_v55 = vpop.f32.mrb[1].mxu0 }
 0x129   :  { %v269_v56 = vpop.f32.mrb[0].mxu1 }
 0x12a   :  { %v270_v58 = vadd.f32 %v269_v56, %v196_v54  ;;  %v334_v59 = vpop.f32.mrb[1].mxu1 }
 0x12c   :  { %v280_v60 = vadd.f32 %v302_v57, %v270_v58 }
 0x12e   :  { %357 = vtanh.f32 %v280_v60 }
 0x138   :  { %v358_v61 = vpop.eup %357 }
 0x139   :  { %283 = vst.msk [vmem:[#allocation10] sm:$0x3] %vm282_vm4, %v358_v61 }
 0x13a   :  { %436 = shalt.err (!%p433_p0)
}
 0x13b   :  { %s437_s3 = scalar_lea.hbm %s569_s4, 32 }
 0x13c   :  { %p438_p1 = scmp.ne.s32.totalorder %s569_s4, %s437_s3  ;;  %p441_p2 = scmp.lt.u32.totalorder %s437_s3, %s569_s4 }
 0x13e   :  { %p443_p3 = pnand %p441_p2, %p438_p1 }
 0x140   :  { %446 = shalt.err (!%p443_p3)
}
 0x141   :  { %293 = dma.vmem_to_hbm [thread:$0]  %s291_s27, 32, %s569_s4, [#allocation6]  }
 0x142   :  { %451 = dma.done.wait [#allocation6], 32  }
 0x143   :  { %452 = vsyncadd [#allocation6], 4294967264 }
 0x144   :  { %297 = vsyncpa [#allocation5], 1 }
 0x145   :  { %298 = vsyncpa [#allocation8], 1 }
 0x146   :  { %299 = vsyncpa [#allocation6], 1 }

// kernel: tpu_custom_call.1
= control target key start
LH: loop header
LB: loop body
LE: loop exit
PB: predicated region body
PF: predicated region fallthrough
CT: control target
= control target key end

     0   :  { %9 = vsyncpa [#allocation5], 0  ;;  %s565_s0 = inlined_call_operand.hbm [shape: f32[2,8,32], index: 0, kind: input, shape index: {}]   ;;  %s566_s1 = inlined_call_operand.hbm [shape: f32[32,64], index: 1, kind: input, shape index: {}]   ;;  %s567_s2 = inlined_call_operand.hbm [shape: f32[32,64], index: 2, kind: input, shape index: {}]   ;;  %s568_s3 = inlined_call_operand.vmem [shape: f32[1,64], index: 3, kind: input, shape index: {}]   ;;  %s569_s4 = inlined_call_operand.hbm [shape: f32[2,64], index: 4, kind: output, shape index: {}]  }
   0x1   :  { %10 = vsyncpa [#allocation8], 0 }
   0x2   :  { %11 = vsyncpa [#allocation6], 0  ;;  %s453_s15 = smov [#allocation7]   ;;  %s454_s17 = smov [#allocation4]  }
   0x3   :  { %s29_s16 = sshll.u32 %s453_s15, 4  ;;  %s17_s18 = sshll.u32 %s454_s17, 4  ;;  %s30_s16 = int_to_ptr.vmem [resolvable:$true] %s29_s16  ;;  %s488_s18 = int_to_ptr.vmem [resolvable:$true] %s17_s18 }
   0x4   :  { %s359_s21 = scalar_lea.hbm %s566_s1, 512 }
   0x5   :  { %p360_p0 = scmp.ne.s32.totalorder %s566_s1, %s359_s21  ;;  %p363_p1 = scmp.lt.u32.totalorder %s359_s21, %s566_s1 }
   0x7   :  { %p365_p2 = pnand %p363_p1, %p360_p0 }
   0x9   :  { %368 = shalt.err (!%p365_p2)
}
   0xa   :  { %s369_s26 = scalar_lea.vmem %s30_s16, 512  ;;  %p374_p4 = scmp.lt.s32.totalorder %s30_s16, %s30_s16 }
   0xb   :  { %p370_p3 = scmp.ne.s32.totalorder %s30_s16, %s369_s26  ;;  %p375_p5 = scmp.lt.s32.totalorder %s369_s26, %s369_s26 }
   0xd   :  { %p376_p6 = por %p375_p5, %p374_p4 }
   0xf   :  { %p377_p7 = pnand %p376_p6, %p370_p3 }
  0x11   :  { %380 = shalt.err (!%p377_p7)
}
  0x12   :  { %s455_s27 = smov 128   ;;  %s456_s28 = smov 8  }
  0x13   :  { %35 = dma.hbm_to_vmem [thread:$0]  %s566_s1, 512, %s30_s16, [#allocation8], %s455_s27, %s455_s27, %s456_s28  }
  0x14   :  { %s381_s7 = scalar_lea.hbm %s565_s0, 256 }
  0x15   :  { %p382_p8 = scmp.ne.s32.totalorder %s565_s0, %s381_s7  ;;  %p385_p9 = scmp.lt.u32.totalorder %s381_s7, %s565_s0 }
  0x17   :  { %p387_p10 = pnand %p385_p9, %p382_p8 }
  0x19   :  { %390 = shalt.err (!%p387_p10)
}
  0x1a   :  { %s391_s12 = scalar_lea.vmem %s488_s18, 256  ;;  %p396_p12 = scmp.lt.s32.totalorder %s488_s18, %s488_s18 }
  0x1b   :  { %p392_p11 = scmp.ne.s32.totalorder %s488_s18, %s391_s12  ;;  %p397_p13 = scmp.lt.s32.totalorder %s391_s12, %s391_s12 }
  0x1d   :  { %p398_p0 = por %p397_p13, %p396_p12 }
  0x1f   :  { %p399_p1 = pnand %p398_p0, %p392_p11 }
  0x21   :  { %402 = shalt.err (!%p399_p1)
}
  0x22   :  { %23 = dma.hbm_to_vmem [thread:$0]  %s565_s0, 256, %s488_s18, [#allocation5], %s455_s27, %s455_s27, %s456_s28  }
  0x23   :  { %s457_s14 = smov [#allocation9]   ;;  %s403_s19 = scalar_lea.hbm %s567_s2, 512 }
  0x24   :  { %s41_s15 = sshll.u32 %s457_s14, 4  ;;  %p404_p2 = scmp.ne.s32.totalorder %s567_s2, %s403_s19  ;;  %s42_s15 = int_to_ptr.vmem [resolvable:$true] %s41_s15 }
  0x25   :  { %p407_p3 = scmp.lt.u32.totalorder %s403_s19, %s567_s2 }
  0x27   :  { %p409_p4 = pnand %p407_p3, %p404_p2 }
  0x29   :  { %412 = shalt.err (!%p409_p4)
}
  0x2a   :  { %s413_s24 = scalar_lea.vmem %s42_s15, 512  ;;  %p418_p6 = scmp.lt.s32.totalorder %s42_s15, %s42_s15 }
  0x2b   :  { %p414_p5 = scmp.ne.s32.totalorder %s42_s15, %s413_s24  ;;  %p419_p7 = scmp.lt.s32.totalorder %s413_s24, %s413_s24 }
  0x2d   :  { %p420_p8 = por %p419_p7, %p418_p6 }
  0x2f   :  { %p421_p9 = pnand %p420_p8, %p414_p5 }
  0x31   :  { %424 = shalt.err (!%p421_p9)
}
  0x32   :  { %47 = dma.hbm_to_vmem [thread:$0]  %s567_s2, 512, %s42_s15, [#allocation8], %s455_s27, %s455_s27, %s456_s28  }
  0x33   :  { %447 = dma.done.wait [#allocation5], 256  }
  0x34   :  { %448 = vsyncadd [#allocation5], 4294967040 }
  0x35   :  { %449 = dma.done.wait [#allocation8], 1024  }
  0x36   :  { %450 = vsyncadd [#allocation8], 4294966272  ;;  %vm63_vm0 = vcmask 254976   ;;  %v458_v0 = vmov 0.0|0.0   ;;  %v459_v1 = vmov 0.0   ;;  %v460_v2 = vmov -inf  }
  0x37   :  { %335 = vmatprep.subr.bf16.mxu0 %v458_v0  ;;  %341 = vmatprep.subr.bf16.mxu1 %v458_v0  ;;  %64 = vst.msk [vmem:[#allocation2] sm:$0x3] %vm63_vm0, %v459_v1  ;;  %65 = vst.msk [vmem:[#allocation3] sm:$0x3] %vm63_vm0, %v460_v2  ;;  %vm461_vm1 = vmmov 0   ;;  %v123_v3 = vld [vmem:[#allocation9] sm:$0xff] }
  0x38   :  { %321 = vmatprep.mubr.msk.f32.mxu0 %vm461_vm1, %v459_v1  ;;  %332 = vmatprep.mubr.msk.f32.mxu1 %vm461_vm1, %v459_v1  ;;  %v124_v4 = vld [vmem:[#allocation9 + $0x8] sm:$0xff]  ;;  %v119_v5 = vld [vmem:[#allocation7] sm:$0xff]  ;;  %vm69_vm2 = vcmask 261120   ;;  %v125_v8 = vld [vmem:[#allocation9 + $0x10] sm:$0xff]  ;;  %vm86_vm3 = vcmask 1041409   ;;  %s462_s26 = smov [#allocation10]  }
  0x39   :  { %v336_v6 = vpack.c.bf16 %v124_v4, %v123_v3  ;;  %v120_v7 = vld [vmem:[#allocation7 + $0x8] sm:$0xff]  ;;  %v126_v9 = vld [vmem:[#allocation9 + $0x18] sm:$0xff]  ;;  %v121_v11 = vld [vmem:[#allocation7 + $0x10] sm:$0xff]  ;;  %s290_s27 = sshll.u32 %s462_s26, 4  ;;  %vm282_vm4 = vcmask 517120   ;;  %s291_s27 = int_to_ptr.vmem [resolvable:$true] %s290_s27 }
  0x3a   :  { %v342_v10 = vpack.c.bf16 %v120_v7, %v119_v5  ;;  %v122_v12 = vld [vmem:[#allocation7 + $0x18] sm:$0xff]  ;;  %v66_v13 = vld [vmem:[#allocation4] sm:$0xff]  ;;  %v339_v14 = vpack.c.bf16 %v126_v9, %v125_v8  ;;  %v302_v57 = vld [vmem:[%s568_s3] ss:$0 sm:$0xff]  ;;  %s425_s28 = scalar_lea.vmem %s291_s27, 32  ;;  %p430_p11 = scmp.lt.s32.totalorder %s291_s27, %s291_s27 }
  0x3b   :  { %337 = vmatpush3.bf16.msra.mxu0 %v336_v6  ;;  %v345_v15 = vpack.c.bf16 %v122_v12, %v121_v11  ;;  %v67_v16 = vld [vmem:[#allocation4 + $0x8] sm:$0xff]  ;;  %v70_v17 = vsel %vm69_vm2, %v66_v13, 0.0  ;;  %v93_v20 = vsel %vm69_vm2, %v66_v13, -inf  ;;  %p426_p10 = scmp.ne.s32.totalorder %s291_s27, %s425_s28  ;;  %p431_p12 = scmp.lt.s32.totalorder %s425_s28, %s425_s28 }
  0x3c   :  { %343 = vmatpush3.bf16.msra.mxu1 %v342_v10  ;;  %338 = vmatprep.subr.bf16.mxu0 %v458_v0  ;;  %v71_v18 = vrot.slane %v70_v17, 4  ;;  %v77_v19 = vsel %vm69_vm2, %v67_v16, 0.0  ;;  %v100_v21 = vsel %vm69_vm2, %v67_v16, -inf  ;;  %v94_v23 = vrot.slane %v93_v20, 4 }
  0x3d   :  { %344 = vmatprep.subr.bf16.mxu1 %v458_v0  ;;  %v78_v22 = vrot.slane %v77_v19, 4  ;;  %v101_v24 = vrot.slane %v100_v21, 4  ;;  %p432_p13 = por %p431_p12, %p430_p11 }
  0x3e   :  { %v72_v25 = vadd.f32 %v71_v18, %v70_v17  ;;  %v95_v27 = vmax.f32 %v93_v20, %v94_v23  ;;  %v68_v42 = vld [vmem:[#allocation2] sm:$0x3]  ;;  %v92_v44 = vld [vmem:[#allocation3] sm:$0x3] }
  0x3f   :  { %340 = vmatpush3.bf16.msra.mxu0 %v339_v14  ;;  %v79_v26 = vadd.f32 %v78_v22, %v77_v19  ;;  %v102_v28 = vmax.f32 %v100_v21, %v101_v24  ;;  %p433_p0 = pnand %p432_p13, %p426_p10 }
  0x40   :  { %346 = vmatpush3.bf16.msra.mxu1 %v345_v15  ;;  %v73_v29 = vrot.slane %v72_v25, 2  ;;  %v96_v31 = vrot.slane %v95_v27, 2 }
  0x41   :  { %v80_v30 = vrot.slane %v79_v26, 2  ;;  %v103_v32 = vrot.slane %v102_v28, 2 }
  0x42   :  { %v74_v33 = vadd.f32 %v73_v29, %v72_v25  ;;  %v97_v35 = vmax.f32 %v95_v27, %v96_v31 }
  0x43   :  { %v81_v34 = vadd.f32 %v80_v30, %v79_v26  ;;  %v104_v36 = vmax.f32 %v102_v28, %v103_v32 }
  0x44   :  { %v75_v37 = vrot.slane %v74_v33, 1  ;;  %v98_v39 = vrot.slane %v97_v35, 1 }
  0x45   :  { %v82_v38 = vrot.slane %v81_v34, 1  ;;  %v105_v40 = vrot.slane %v104_v36, 1 }
  0x46   :  { %v76_v41 = vadd.f32 %v75_v37, %v74_v33  ;;  %v99_v45 = vmax.f32 %v97_v35, %v98_v39 }
  0x47   :  { %v83_v43 = vadd.f32 %v82_v38, %v81_v34  ;;  %v106_v46 = vmax.f32 %v104_v36, %v105_v40 }
  0x49   :  { %v87_v47 = vsel %vm86_vm3, %v83_v43, %v76_v41  ;;  %v109_v48 = vsel %vm86_vm3, %v106_v46, %v99_v45 }
  0x4a   :  { %v89_v49 = vadd.f32 %v87_v47, %v68_v42  ;;  %v111_v50 = vmax.f32 %v92_v44, %v109_v48 }
  0x4c   :  { %112 = vst.msk [vmem:[#allocation3] sm:$0x3] %vm63_vm0, %v111_v50  ;;  %91 = vst.msk [vmem:[#allocation2] sm:$0x3] %vm63_vm0, %v89_v49 }
  0x53   :  { %v118_v51 = vld [vmem:[#allocation3] sm:$0x3]  ;;  %v116_v52 = vld [vmem:[#allocation2] sm:$0x3] }
  0x54   :  { %322 = vmatmul.mubr.msk.f32.vlgmr.msra.gmra.mrb[0].mxu0 %vm69_vm2, %v118_v51  ;;  %v117_v53 = vmul.f32 0.125, %v116_v52 }
  0x56   :  { %333 = vmatmul.mubr.msk.f32.vlgmr.msra.gmra.mrb[0].mxu1 %vm69_vm2, %v117_v53 }
 0x127   :  { %v196_v54 = vpop.f32.mrb[0].mxu0 }
 0x128   :  { %v323_v55 = vpop.f32.mrb[1].mxu0 }
 0x129   :  { %v269_v56 = vpop.f32.mrb[0].mxu1 }
 0x12a   :  { %v270_v58 = vadd.f32 %v269_v56, %v196_v54  ;;  %v334_v59 = vpop.f32.mrb[1].mxu1 }
 0x12c   :  { %v280_v60 = vadd.f32 %v302_v57, %v270_v58 }
 0x12e   :  { %357 = vtanh.f32 %v280_v60 }
 0x138   :  { %v358_v61 = vpop.eup %357 }
 0x139   :  { %283 = vst.msk [vmem:[#allocation10] sm:$0x3] %vm282_vm4, %v358_v61 }
 0x13a   :  { %436 = shalt.err (!%p433_p0)
}
 0x13b   :  { %s437_s3 = scalar_lea.hbm %s569_s4, 32 }
 0x13c   :  { %p438_p1 = scmp.ne.s32.totalorder %s569_s4, %s437_s3  ;;  %p441_p2 = scmp.lt.u32.totalorder %s437_s3, %s569_s4 }
 0x13e   :  { %p443_p3 = pnand %p441_p2, %p438_p1 }
 0x140   :  { %446 = shalt.err (!%p443_p3)
}
 0x141   :  { %293 = dma.vmem_to_hbm [thread:$0]  %s291_s27, 32, %s569_s4, [#allocation6]  }
 0x142   :  { %451 = dma.done.wait [#allocation6], 32  }
 0x143   :  { %452 = vsyncadd [#allocation6], 4294967264 }
 0x144   :  { %297 = vsyncpa [#allocation5], 1 }
 0x145   :  { %298 = vsyncpa [#allocation8], 1 }
 0x146   :  { %299 = vsyncpa [#allocation6], 1 }

</bundles_post_ra>
